<compile_context>
chip_gen: v7x
topology: tpu7x:2x2x1
jax: 0.10.0
libtpu: 0.0.40
codegen_flags: <defaults>
</compile_context>

<pallas_src>
import jax
import jax.numpy as jnp
from jax.experimental import pallas as pl
from jax.experimental.pallas import tpu as pltpu

_TARGET_BLOCK_BYTES = 2 * 1024 * 1024  # ~2 MiB per x/out block


def _pick_block(total: int, align: int, max_size: int) -> int:
    """Largest multiple of `align` that evenly divides `total` and is
    <= max_size.  Falls back to `total` (full dim is always legal for a
    BlockSpec) when `total` is not a multiple of `align` or it already fits."""
    if total % align != 0 or total <= max_size:
        return total
    best = align
    d = align
    while d <= max_size:
        if total % d == 0:
            best = d
        d += align
    return best


def _add_bias_kernel(bias_ref, x_ref, o_ref):
    # bias_ref : (TC, 1)  VMEM, already scaled by lr_mult and cast to x.dtype
    # x_ref/o_ref: (TC, TS) VMEM (leading N dim squeezed by the BlockSpec)
    o_ref[...] = x_ref[...] + bias_ref[...]   # lane broadcast on the VPU


def add_bias(x: jax.Array, bias: jax.Array, lr_mult: float = 1.0) -> jax.Array:
    """Pallas equivalent of AddBias.forward for NCHW inputs."""
    N, C, H, W = x.shape
    assert bias.shape == (C,)
    S = H * W
    itemsize = jnp.dtype(x.dtype).itemsize

    # Lane-dense layout: flattened spatial axis on lanes.
    x3 = x.reshape(N, C, S)
    # Pre-scale bias by lr_mult in the (tiny) wrapper; cast to activation dtype
    # (matches the original kernel's numerics).
    bias2 = (lr_mult * bias).astype(x.dtype).reshape(C, 1)

    # ---- tile selection -----------------------------------------------------
    min_tc = C if C % 8 != 0 else 8
    ts = _pick_block(S, 128, max(128, _TARGET_BLOCK_BYTES // (min_tc * itemsize)))
    if C % 8 != 0:
        tc = C
    else:
        max_tc = max(8, _TARGET_BLOCK_BYTES // (ts * itemsize))
        tc = _pick_block(C, 8, max_tc)

    grid = (N, C // tc, S // ts)

    out3 = pl.pallas_call(
        _add_bias_kernel,
        out_shape=jax.ShapeDtypeStruct((N, C, S), x.dtype),
        grid=grid,
        in_specs=[
            # per-channel bias column in VMEM, blocked over channels
            pl.BlockSpec((tc, 1), lambda n, ci, si: (ci, 0)),
            # (TC, TS) lane-dense slab of x; leading N dim squeezed
            pl.BlockSpec((None, tc, ts), lambda n, ci, si: (n, ci, si)),
        ],
        out_specs=pl.BlockSpec((None, tc, ts), lambda n, ci, si: (n, ci, si)),
        compiler_params=pltpu.CompilerParams(
            dimension_semantics=("parallel", "parallel", "parallel"),
            vmem_limit_bytes=32 * 1024 * 1024,
        ),
        # If the caller does not need x afterwards, donating it saves a full
        # NCHW HBM allocation: add  input_output_aliases={1: 0}
    )(bias2, x3)

    return out3.reshape(N, C, H, W)


class AddBias:
    """Minimal JAX mirror of the PyTorch module (reset_parameters -> zeros;
    a nonzero bias can be assigned for testing)."""

    def __init__(self, features: int, lr_mult: float = 1.0):
        self.features = features
        self.lr_mult = lr_mult
        self.bias = jnp.zeros((features,), dtype=jnp.float32)  # nn.init.zeros_

    def __call__(self, x: jax.Array) -> jax.Array:
        return add_bias(x, self.bias, self.lr_mult)


if __name__ == "__main__":
    key = jax.random.PRNGKey(0)
    kx, kb = jax.random.split(key)

    N, C, H, W = 2, 4, 16, 16
    lr_mult = 0.5

    x = jax.random.normal(kx, (N, C, H, W), dtype=jnp.float32)

    mod = AddBias(C, lr_mult=lr_mult)
    # Module init is zeros (trivial); overwrite with a deterministic nonzero
    # bias so the broadcast/scale path is actually exercised.
    mod.bias = jax.random.normal(kb, (C,), dtype=jnp.float32)

    y = jax.block_until_ready(mod(x))

    # Pure-JAX reference of the PyTorch forward: x + lr_mult * bias[:,None,None]
    ref = x + lr_mult * mod.bias[None, :, None, None]
    assert y.shape == x.shape and y.dtype == x.dtype
    assert jnp.allclose(y, ref, atol=1e-6, rtol=1e-6)

    print("KERNEL_OK")
</pallas_src>

<mosaic_0001>
module attributes {stable_mosaic.version = 11 : i64} {
  func.func @_add_bias_kernel(%arg0: i32, %arg1: i32, %arg2: i32, %arg3: memref<4x1xf32, #tpu.memory_space<vmem>>, %arg4: memref<1x4x256xf32, #tpu.memory_space<vmem>>, %arg5: memref<1x4x256xf32, #tpu.memory_space<vmem>>) attributes {dimension_semantics = [#tpu.dimension_semantics<parallel>, #tpu.dimension_semantics<parallel>, #tpu.dimension_semantics<parallel>], iteration_bounds = array<i64: 2, 1, 1>, scalar_prefetch = 0 : i64, scratch_operands = 0 : i64, tpu.core_type = #tpu.core_type<tc>, window_params = [{transform_indices = @transform_0, window_bounds = array<i64: 4, 1>}, {transform_indices = @transform_1, window_bounds = array<i64: 1, 4, 256>}, {transform_indices = @transform_2, window_bounds = array<i64: 1, 4, 256>}]} {
    %c0 = arith.constant 0 : index
    %c0_0 = arith.constant 0 : index
    %c0_1 = arith.constant 0 : index
    %0 = vector.load %arg4[%c0, %c0_0, %c0_1] : memref<1x4x256xf32, #tpu.memory_space<vmem>>, vector<1x4x256xf32>
    %1 = vector.shape_cast %0 : vector<1x4x256xf32> to vector<4x256xf32>
    %c0_2 = arith.constant 0 : index
    %c0_3 = arith.constant 0 : index
    %2 = vector.load %arg3[%c0_2, %c0_3] : memref<4x1xf32, #tpu.memory_space<vmem>>, vector<4x1xf32>
    %3 = vector.broadcast %2 : vector<4x1xf32> to vector<4x256xf32>
    %4 = arith.addf %1, %3 : vector<4x256xf32>
    %c0_4 = arith.constant 0 : index
    %c0_5 = arith.constant 0 : index
    %c0_6 = arith.constant 0 : index
    %5 = vector.load %arg5[%c0_4, %c0_5, %c0_6] : memref<1x4x256xf32, #tpu.memory_space<vmem>>, vector<1x4x256xf32>
    %6 = vector.shape_cast %5 : vector<1x4x256xf32> to vector<4x256xf32>
    %7 = vector.shape_cast %4 : vector<4x256xf32> to vector<1x4x256xf32>
    tpu.vector_store %arg5[%c0_4, %c0_5, %c0_6], %7 {strides = array<i32>} : memref<1x4x256xf32, #tpu.memory_space<vmem>>, vector<1x4x256xf32>,
    return
  }
  func.func @transform_0(%arg0: i32, %arg1: i32, %arg2: i32) -> (i32, i32) {
    %c0_i32 = arith.constant 0 : i32
    %c0_i32_0 = arith.constant 0 : i32
    return %arg1, %c0_i32 : i32, i32
  }
  func.func @transform_1(%arg0: i32, %arg1: i32, %arg2: i32) -> (i32, i32, i32) {
    %c0_i32 = arith.constant 0 : i32
    return %arg0, %arg1, %arg2 : i32, i32, i32
  }
  func.func @transform_2(%arg0: i32, %arg1: i32, %arg2: i32) -> (i32, i32, i32) {
    %c0_i32 = arith.constant 0 : i32
    return %arg0, %arg1, %arg2 : i32, i32, i32
  }
}

</mosaic_0001>

<bundles_post_ra>
// kernel: tpu_custom_call.1
= control target key start
LH: loop header
LB: loop body
LE: loop exit
PB: predicated region body
PF: predicated region fallthrough
CT: control target
= control target key end

     0   :  { %7 = vsyncpa [#allocation3], 0  ;;  %s742_s0 = inlined_call_operand.vmem [shape: f32[4,1], index: 0, kind: input, shape index: {}]   ;;  %s743_s1 = inlined_call_operand.hbm [shape: f32[2,4,256], index: 1, kind: input, shape index: {}]   ;;  %s744_s2 = inlined_call_operand.hbm [shape: f32[2,4,256], index: 2, kind: output, shape index: {}]  }
   0x1   :  { %9 = vsyncpa [#allocation3 + $0x1], 0 }
   0x2   :  { %10 = vsyncpa [#allocation4], 0 }
   0x3   :  { %12 = vsyncpa [#allocation4 + $0x1], 0  ;;  %s567_s9 = smov 0   ;;  %s569_s10 = smov 0  }
   0x4   :  { %s571_s11 = smov 0   ;;  %s573_s12 = smov 0  }
   0x5   :  { %s575_s13 = smov 0   ;;  %s577_s14 = smov 0  }
   0x6 LB: > { %s351_s15 = sadd.s32 4294967295, %s546_s14   ;;  %s352_s16 = sadd.s32 4294967294, %s546_s14   ;;  %s546_s14 = sphi %s577_s14, %s18_s14   ;;  %s542_s13 = sphi %s575_s13, %s760_s13   ;;  %s538_s12 = sphi %s573_s12, %s759_s12   ;;  %s534_s11 = sphi %s571_s11, %s758_s11   ;;  %s530_s10 = sphi %s569_s10, %s757_s10   ;;  %s526_s9 = sphi %s567_s9, %s756_s9  }
   0x7   : > { %s37_s17 = sadd.s32 1, %s542_s13  ;;  %s74_s18 = sadd.s32 1, %s534_s11 }
   0x8   : > { %p39_p0 = scmp.ge.s32.totalorder %s37_s17, 2  ;;  %p81_p1 = scmp.ne.s32.totalorder %s534_s11, %s530_s10 }
   0x9   : > { %p82_p2 = scmp.eq.s32.totalorder %s546_s14, 0  ;;  %p87_p3 = scmp.ne.s32.totalorder %s530_s10, %s526_s9 }
   0xa   : > { %s762_s17 = smov (%p39_p0, %s37_s17), 0  ;;  %p88_p5 = scmp.eq.s32.totalorder %s351_s15, 0 }
   0xb   : > { %p608_p4 = por %p82_p2, %p81_p1  ;;  %s67_s20 = ssub.s32 %s542_s13, %s762_s17 }
   0xc   : > { %p115_p6 = scmp.eq.s32.totalorder %s351_s15, 1  ;;  %p72_p7 = scmp.eq.s32.totalorder %s67_s20, 0 }
   0xd   : > { %p614_p8 = por %p88_p5, %p87_p3  ;;  %p121_p10 = scmp.eq.s32.totalorder %s352_s16, 1 }
   0xe   : > { %p618_p9 = por %p115_p6, %p81_p1  ;;  %p381_p13 = scmp.lt.s32.totalorder %s546_s14, 2 }
   0xf   : > { %s623_s23 = scalar_select %p72_p7, %s534_s11, %s74_s18  }
  0x10   : > { %s748_s22 = scalar_select %p618_p9, 1, 0 }
  0x11   : > { %p625_p11 = por %p121_p10, %p87_p3  ;;  %s148_s25 = sand.u32 1, %s534_s11  }
  0x12   : > { %s356_s26 = sshll.u32 %s148_s25, 3  ;;  %s367_s27 = sshll.u32 %s542_s13, 7 }
  0x13   : > { %s749_s24 = scalar_select %p625_p11, 1, 0 }
  0x14   : > { %s636_s30 = scalar_lea.hbm %s743_s1, %s367_s27  ;;  %s152_s3 = scalar_lea.vmem [#allocation2], %s356_s26 }
  0x15   : > { %s164_s4 = sshll.u32 %s152_s3, 4  ;;  %p642_p0 = pnand %p381_p13, %p608_p4  ;;  %s638_s4 = int_to_ptr.vmem [resolvable:$true] %s164_s4 }
  0x16   : > { %s149_s6 = scalar_lea.sflag [#allocation3], %s148_s25  ;;  %s434_s7 = scalar_lea.hbm %s636_s30, 128 }
  0x17   : > { %p435_p3 = scmp.ne.s32.totalorder %s636_s30, %s434_s7  ;;  %p436_p5 = pneg %p642_p0 }
  0x18   : > { %s439_s16 = scalar_lea.hbm %s743_s1, 256  ;;  %p440_p4 = scmp.lt.u32.totalorder %s636_s30, %s743_s1 }
  0x19   : > { %p437_p6 = pnand %p436_p5, %p435_p3  ;;  %p441_p10 = scmp.lt.u32.totalorder %s439_s16, %s434_s7 }
  0x1a   : > { %p443_p12 = scmp.lt.u32.totalorder %s434_s7, %s636_s30 }
  0x1b   : > { %p438_p7 = pneg %p437_p6  ;;  %p442_p13 = por %p441_p10, %p440_p4 }
  0x1d   : > { %p444_p1 = por %p443_p12, %p442_p13 }
  0x1f   : > { %p445_p2 = pnand %p444_p1, %p438_p7 }
  0x21   : > { %448 = shalt.err (!%p445_p2)
}
  0x22   : > { %s449_s20 = scalar_lea.vmem %s638_s4, 128  ;;  %s548_s25 = smov [#allocation2]  }
  0x23   : > { %p450_p3 = scmp.ne.s32.totalorder %s638_s4, %s449_s20  ;;  %s454_s26 = sshll.u32 %s548_s25, 4  ;;  %s455_s26 = int_to_ptr.vmem [resolvable:$false] %s454_s26 }
  0x24   : > { %s456_s27 = scalar_lea.vmem %s455_s26, 256  ;;  %p457_p9 = scmp.lt.s32.totalorder %s638_s4, %s455_s26 }
  0x25   : > { %p452_p6 = pnand %p450_p3, %p436_p5  ;;  %p458_p4 = scmp.lt.s32.totalorder %s456_s27, %s449_s20 }
  0x27   : > { %p453_p11 = pneg %p452_p6  ;;  %p459_p10 = por %p458_p4, %p457_p9 }
  0x29   : > { %p460_p12 = pnand %p459_p10, %p453_p11 }
  0x2b   : > { %463 = shalt.err (!%p460_p12)
}
  0x2c   : > { %376 = dma.hbm_to_vmem [thread:$0]  (!%p642_p0), %s636_s30, 128, %s638_s4, %s149_s6  }
  0x2d   : > { %p751_p1 = scmp.lt.s32.totalorder %s546_s14, 3  ;;  %p752_p2 = scmp.ge.s32.totalorder %s546_s14, 1 }
  0x2f   : > { %p170_p5 = pnand %p752_p2, %p751_p1 }
  0x30   : > { %s678_s28 = sand.u32 (!%p170_p5), 1, %s530_s10  }
  0x31   : > { %173 = sbr.rel (%p170_p5) target bundleno = 205 (0xcd), region = 28  ;;  %s360_s29 = sshll.u32 (!%p170_p5), %s678_s28, 3 }
  0x32   : > { %s176_s3 = scalar_lea.sflag (!%p170_p5), [#allocation3], %s678_s28  ;;  %s179_s7 = scalar_lea.vmem (!%p170_p5), [#allocation2], %s360_s29 }
  0x38   : > { %517 = dma.done.wait (%p614_p8), %s176_s3, 128  }
  0x39   : > { %519 = vsyncadd (%p614_p8), %s176_s3, 4294967168  ;;  %v549_v0 = vmov 0   ;;  %v211_v1 = vld [vmem:[%s742_s0] sm:$0xf]  ;;  %v550_v2 = vmov 839922192   ;;  %v219_v4 = vlaneseq }
  0x3a   : > { %433 = vset.pattern.permute.xlu0 %v549_v0  ;;  %v217_v3 = vunpack.c.l.s4 %v550_v2  ;;  %v210_v9 = vld [vmem:[%s179_s7] sm:$0xff]  ;;  %s368_s21 = sshll.u32 %s538_s12, 7  ;;  %s203_s5 = scalar_lea.vmem [#allocation5], %s360_s29 }
  0x3b   : > { %214 = vperm.xlu0 %433, %v211_v1   ;;  %v220_v6 = vshrl.u32 %v219_v4, 7  ;;  %s245_s6 = sshll.u32 %s203_s5, 4  ;;  %s693_s16 = scalar_lea.hbm %s744_s2, %s368_s21  ;;  %s695_s6 = int_to_ptr.vmem [resolvable:$true] %s245_s6 }
  0x3c   : > { %v218_v5 = vunpack.c.0.s8 %v217_v3  ;;  %s227_s18 = scalar_lea.sflag [#allocation4], %s678_s28  ;;  %s464_s19 = scalar_lea.vmem %s695_s6, 128 }
  0x3d   : > { %p465_p8 = scmp.ne.s32.totalorder %s695_s6, %s464_s19  ;;  %p753_p9 = scmp.ne.s32.totalorder %s748_s22, 0 }
  0x3e   : > { %v221_v7 = vsub.s32 %v218_v5, %v220_v6  ;;  %s551_s12 = smov [#allocation5]  }
  0x3f   : > { %p466_p11 = pnand %p465_p8, %p753_p9  ;;  %s468_s20 = sshll.u32 %s551_s12, 4  ;;  %s469_s20 = int_to_ptr.vmem [resolvable:$false] %s468_s20 }
  0x40   : > { %s470_s25 = scalar_lea.vmem %s469_s20, 256  ;;  %p471_p7 = scmp.lt.s32.totalorder %s695_s6, %s469_s20 }
  0x41   : > { %p467_p0 = pneg %p466_p11  ;;  %p472_p13 = scmp.lt.s32.totalorder %s470_s25, %s464_s19 }
  0x43   : > { %p473_p3 = por %p472_p13, %p471_p7 }
  0x45   : > { %p474_p6 = pnand %p473_p3, %p467_p0 }
  0xba   : > { %v215_v8 = vpop.permute.xlu0 %214 }
  0xbb   : > { %v222_v10 = vrot.slane %v215_v8, %v221_v7 }
  0xbd   : > { %v224_v11 = vadd.f32 %v222_v10, %v210_v9 }
  0xbf   : > { %225 = vst [vmem:[%s203_s5] sm:$0xff] %v224_v11 }
  0xc0   : > { %477 = shalt.err (!%p474_p6)
}
  0xc1   : > { %s478_s26 = scalar_lea.hbm %s693_s16, 128  ;;  %s482_s29 = scalar_lea.hbm %s744_s2, 256 }
  0xc2   : > { %p479_p4 = scmp.ne.s32.totalorder %s693_s16, %s478_s26  ;;  %p483_p1 = scmp.lt.u32.totalorder %s693_s16, %s744_s2 }
  0xc3   : > { %p484_p2 = scmp.lt.u32.totalorder %s482_s29, %s478_s26  ;;  %p486_p8 = scmp.lt.u32.totalorder %s478_s26, %s693_s16 }
  0xc4   : > { %p480_p10 = pnand %p479_p4, %p753_p9 }
  0xc5   : > { %p485_p5 = por %p484_p2, %p483_p1 }
  0xc6   : > { %p481_p12 = pneg %p480_p10 }
  0xc7   : > { %p487_p11 = por %p486_p8, %p485_p5 }
  0xc9   : > { %p488_p0 = pnand %p487_p11, %p481_p12 }
  0xcb   : > { %491 = shalt.err (!%p488_p0)
}
  0xcc   : > { %371 = dma.vmem_to_hbm [thread:$0]  (%p753_p9), %s695_s6, 128, %s693_s16, %s227_s18  }
  0xcd PF: > { %s257_s30 = sand.u32 1, %s526_s9   ;;  %p754_p7 = scmp.ne.s32.totalorder %s749_s24, 0 }
  0xce   : > { %p755_p13 = scmp.ge.s32.totalorder %s546_s14, 2  ;;  %s258_s4 = scalar_lea.sflag [#allocation4], %s257_s30 }
  0xd0   : > { %p378_p3 = pnand %p755_p13, %p754_p7 }
  0xd2   : > { %521 = dma.done.wait (!%p378_p3), %s258_s4, 128  }
  0xd3   : > { %523 = vsyncadd (!%p378_p3), %s258_s4, 4294967168  ;;  %s18_s14 = sadd.s32 1, %s546_s14   ;;  %s756_s9 = smov %s530_s10 }
  0xd4   : > { %p15_p6 = scmp.ge.s32.totalorder %s18_s14, 4   ;;  %s757_s10 = smov %s534_s11 }
  0xd5   : > { %s758_s11 = smov %s623_s23  ;;  %s759_s12 = smov %s542_s13 }
  0xd6   : > { %s760_s13 = smov %s762_s17  ;;  %17 = sbr.rel (!%p15_p6) target bundleno = 6 (0x6), region = 76 }
  0xdd   :  { %263 = vsyncpa [#allocation3], 1 }
  0xde   :  { %265 = vsyncpa [#allocation3 + $0x1], 1 }
  0xdf   :  { %266 = vsyncpa [#allocation4], 1 }
  0xe0   :  { %268 = vsyncpa [#allocation4 + $0x1], 1 }

</bundles_post_ra>
